<compile_context>
chip_gen: v7x
topology: tpu7x:2x2x1
jax: 0.10.0
libtpu: 0.0.40
codegen_flags: <defaults>
</compile_context>

<pallas_src>
import jax
import jax.numpy as jnp
from jax import lax
from jax.experimental import pallas as pl
from jax.experimental.pallas import tpu as pltpu
import numpy as np

NUM_CLASSES = 5                    # output dim A of the net
IMG_C, IMG_H, IMG_W = 3, 84, 84    # hard-coded reshape in NTKernel.forward
C_INDEX = 2                        # the `c` argument of NTKernel


# ----------------------------------------------------------------------------
# A tiny deterministic stand-in for `net` (Conv -> ReLU -> avg-pool -> Linear).
# ----------------------------------------------------------------------------
def init_net_params(key):
    k1, k2, k3, k4 = jax.random.split(key, 4)
    return {
        "conv.weight": 0.1 * jax.random.normal(k1, (4, 3, 3, 3), jnp.float32),
        "conv.bias":   0.1 * jax.random.normal(k2, (4,), jnp.float32),
        "fc.weight":   0.1 * jax.random.normal(k3, (NUM_CLASSES, 196), jnp.float32),
        "fc.bias":     0.1 * jax.random.normal(k4, (NUM_CLASSES,), jnp.float32),
    }


def net_apply(params, x):
    """x: (B, 3, 84, 84) NCHW -> logits (B, NUM_CLASSES)."""
    y = lax.conv_general_dilated(
        x, params["conv.weight"], window_strides=(3, 3), padding="VALID",
        dimension_numbers=("NCHW", "OIHW", "NCHW"))            # (B, 4, 28, 28)
    y = y + params["conv.bias"][None, :, None, None]
    y = jax.nn.relu(y)
    B = y.shape[0]
    y = y.reshape(B, 4, 7, 4, 7, 4).mean(axis=(3, 5))          # 4x4 avg pool -> (B,4,7,7)
    y = y.reshape(B, -1)                                       # (B, 196)
    return y @ params["fc.weight"].T + params["fc.bias"]       # (B, NUM_CLASSES)


def fnet_single(params, x):
    """Equivalent of the torch `fnet_single`: single image (3,84,84) -> (A,)."""
    return net_apply(params, x[None])[0]


# ----------------------------------------------------------------------------
# Jacobian glue (autodiff — stays in plain JAX).
# Only output row `c` is needed, so use grad of a scalar instead of full jacrev.
# ----------------------------------------------------------------------------
def scaled_flat_jacobian_c(params, scaling_params, xb, key_order, c, fold_scale_sq):
    """Per-sample gradient of output[c] w.r.t. all params, flattened -> (B, F).

    If fold_scale_sq, the per-parameter scaling of BOTH jacobians is folded in
    here as scale**2 (the other side is left unscaled); exactly equivalent to
    scaling both sides since the Gram contraction is over the param axis.
    """
    def f_c(p, x):
        return fnet_single(p, x)[c]

    grads = jax.vmap(jax.grad(f_c), in_axes=(None, 0))(params, xb)  # dict of (B, *shape)
    B = xb.shape[0]
    pieces = []
    for k in key_order:
        g = grads[k].reshape(B, -1)
        if fold_scale_sq:
            g = (scaling_params[k] * scaling_params[k]) * g
        pieces.append(g)
    return jnp.concatenate(pieces, axis=-1)                         # (B, F_total)


# ----------------------------------------------------------------------------
# Pallas kernel: class-c Gram matrix  out = J1c @ J2c^T, F tiled as a reduction.
# ----------------------------------------------------------------------------
def _ntk_kernel(j1_ref, j2_ref, out_ref, acc_ref):
    # j1_ref: (tm, tk), j2_ref: (tn, tk), out_ref/acc_ref: (tm, tn)
    @pl.when(pl.program_id(2) == 0)
    def _():
        acc_ref[...] = jnp.zeros_like(acc_ref)

    acc_ref[...] += lax.dot_general(
        j1_ref[...], j2_ref[...],
        dimension_numbers=(((1,), (1,)), ((), ())),
        preferred_element_type=jnp.float32,
        precision=lax.Precision.HIGHEST)

    @pl.when(pl.program_id(2) == pl.num_programs(2) - 1)
    def _():
        out_ref[...] = acc_ref[...].astype(out_ref.dtype)


def _round_up(x, m):
    return ((x + m - 1) // m) * m


def ntk_gram_c(j1c, j2c, *, tm=128, tn=128, tk=2048):
    """j1c: (N, F), j2c: (M, F) -> (N, M) = j1c @ j2c^T on the MXU."""
    N, F = j1c.shape
    M, F2 = j2c.shape
    assert F == F2

    # Full-extent blocks for small dims (no padding, exempt from (8,128) rule);
    # 128-aligned tiles + minimal zero-padding once a dim is actually tiled.
    tm = N if N < tm else tm
    tn = M if M < tn else tn
    tk = F if F < tk else tk
    Np, Mp, Fp = _round_up(N, tm), _round_up(M, tn), _round_up(F, tk)

    if (Np, Fp) != (N, F):
        j1c = jnp.pad(j1c, ((0, Np - N), (0, Fp - F)))   # zero rows/cols contribute 0
    if (Mp, Fp) != (M, F):
        j2c = jnp.pad(j2c, ((0, Mp - M), (0, Fp - F)))

    out = pl.pallas_call(
        _ntk_kernel,
        out_shape=jax.ShapeDtypeStruct((Np, Mp), jnp.float32),
        grid_spec=pltpu.PrefetchScalarGridSpec(
            num_scalar_prefetch=0,
            grid=(Np // tm, Mp // tn, Fp // tk),
            in_specs=[pl.BlockSpec((tm, tk), lambda i, j, k: (i, k)),
                      pl.BlockSpec((tn, tk), lambda i, j, k: (j, k))],
            out_specs=pl.BlockSpec((tm, tn), lambda i, j, k: (i, j)),
            scratch_shapes=[pltpu.VMEM((tm, tn), jnp.float32)]),
        compiler_params=pltpu.CompilerParams(
            dimension_semantics=("parallel", "parallel", "arbitrary")),
    )(j1c, j2c)

    if (Np, Mp) != (N, M):
        out = out[:N, :M]
    return out


# ----------------------------------------------------------------------------
# NTKernel.forward equivalent
# ----------------------------------------------------------------------------
def nt_kernel_forward(params, scaling_params, x1_flat, x2_flat, c=C_INDEX, diag=False):
    N, M = x1_flat.shape[0], x2_flat.shape[0]
    x1 = x1_flat.reshape(N, IMG_C, IMG_H, IMG_W)
    x2 = x2_flat.reshape(M, IMG_C, IMG_H, IMG_W)
    key_order = list(params.keys())
    j1 = scaled_flat_jacobian_c(params, scaling_params, x1, key_order, c,
                                fold_scale_sq=True)                 # (N, F)
    j2 = scaled_flat_jacobian_c(params, scaling_params, x2, key_order, c,
                                fold_scale_sq=False)                # (M, F)
    result = ntk_gram_c(j1, j2)                                     # (N, M)
    if diag:
        return jnp.diag(result)
    return result


# ----------------------------------------------------------------------------
# Pure-JAX reference of the ORIGINAL module semantics (full jacrev, both-sided
# scaling, einsum over all classes, then [:, :, c]).
# ----------------------------------------------------------------------------
def _scaled_flat_jacobian_full(params, scaling_params, xb, key_order):
    jac = jax.vmap(jax.jacrev(fnet_single), in_axes=(None, 0))(params, xb)
    B = xb.shape[0]
    pieces = [(scaling_params[k] * jac[k]).reshape(B, NUM_CLASSES, -1)
              for k in key_order]
    return jnp.concatenate(pieces, axis=-1)                         # (B, A, F)


if __name__ == "__main__":
    key = jax.random.PRNGKey(0)
    kp, kx1, kx2 = jax.random.split(key, 3)

    params = init_net_params(kp)
    # deterministic per-parameter scaling factors (scalars broadcast like torch)
    scaling_params = {k: jnp.float32(1.0 + 0.25 * i)
                      for i, k in enumerate(params.keys())}

    N, M = 2, 3
    x1 = jax.random.normal(kx1, (N, IMG_C * IMG_H * IMG_W), jnp.float32)
    x2 = jax.random.normal(kx2, (M, IMG_C * IMG_H * IMG_W), jnp.float32)

    out = nt_kernel_forward(params, scaling_params, x1, x2, c=C_INDEX)
    out = jax.block_until_ready(out)

    # reference: original semantics (all classes), then slice class c
    key_order = list(params.keys())
    j1f = _scaled_flat_jacobian_full(params, scaling_params,
                                     x1.reshape(N, IMG_C, IMG_H, IMG_W), key_order)
    j2f = _scaled_flat_jacobian_full(params, scaling_params,
                                     x2.reshape(M, IMG_C, IMG_H, IMG_W), key_order)
    ref = jnp.einsum("naf,maf->nma", j1f, j2f,
                     precision=lax.Precision.HIGHEST)[:, :, C_INDEX]
    np.testing.assert_allclose(np.asarray(out), np.asarray(ref),
                               rtol=2e-4, atol=1e-5)

    assert out.shape == (N, M) and out.dtype == jnp.float32
    print("KERNEL_OK")
</pallas_src>

<mosaic_0001>
module attributes {stable_mosaic.version = 11 : i64} {
  func.func @_ntk_kernel(%arg0: i32, %arg1: i32, %arg2: i32, %arg3: memref<2x1097xf32, #tpu.memory_space<vmem>>, %arg4: memref<3x1097xf32, #tpu.memory_space<vmem>>, %arg5: memref<2x3xf32, #tpu.memory_space<vmem>>, %arg6: memref<2x3xf32, #tpu.memory_space<vmem>>) attributes {dimension_semantics = [#tpu.dimension_semantics<parallel>, #tpu.dimension_semantics<parallel>, #tpu.dimension_semantics<arbitrary>], iteration_bounds = array<i64: 1, 1, 1>, scalar_prefetch = 0 : i64, scratch_operands = 1 : i64, tpu.core_type = #tpu.core_type<tc>, window_params = [{transform_indices = @transform_0, window_bounds = array<i64: 2, 1097>}, {transform_indices = @transform_1, window_bounds = array<i64: 3, 1097>}, {transform_indices = @transform_2, window_bounds = array<i64: 2, 3>}]} {
    %c0_i32 = arith.constant 0 : i32
    %0 = arith.cmpi eq, %arg2, %c0_i32 : i32
    %1 = arith.extui %0 : i1 to i32
    %c0_i32_0 = arith.constant 0 : i32
    %2 = arith.cmpi ne, %1, %c0_i32_0 : i32
    scf.if %2 {
      %cst_10 = arith.constant 0.000000e+00 : f32
      %12 = vector.broadcast %cst_10 : f32 to vector<2x3xf32>
      %c0_11 = arith.constant 0 : index
      %c0_12 = arith.constant 0 : index
      %13 = vector.load %arg6[%c0_11, %c0_12] : memref<2x3xf32, #tpu.memory_space<vmem>>, vector<2x3xf32>
      tpu.vector_store %arg6[%c0_11, %c0_12], %12 {strides = array<i32>} : memref<2x3xf32, #tpu.memory_space<vmem>>, vector<2x3xf32>,
    } else {
    }
    %c0 = arith.constant 0 : index
    %c0_1 = arith.constant 0 : index
    %3 = vector.load %arg6[%c0, %c0_1] : memref<2x3xf32, #tpu.memory_space<vmem>>, vector<2x3xf32>
    %c0_2 = arith.constant 0 : index
    %c0_3 = arith.constant 0 : index
    %4 = vector.load %arg3[%c0_2, %c0_3] : memref<2x1097xf32, #tpu.memory_space<vmem>>, vector<2x1097xf32>
    %c0_4 = arith.constant 0 : index
    %c0_5 = arith.constant 0 : index
    %5 = vector.load %arg4[%c0_4, %c0_5] : memref<3x1097xf32, #tpu.memory_space<vmem>>, vector<3x1097xf32>
    %cst = arith.constant dense<0.000000e+00> : vector<2x3xf32>
    %6 = tpu.matmul %4, %5, %cst {dimension_numbers = #tpu.dot_dimension_numbers<[1], [1], [0], [0], [0, 0, 1, 0], [], []>, precision = #tpu.contract_precision<fp32>} : vector<2x1097xf32>, vector<3x1097xf32>, vector<2x3xf32> -> vector<2x3xf32>
    %7 = arith.addf %3, %6 : vector<2x3xf32>
    %c0_6 = arith.constant 0 : index
    %c0_7 = arith.constant 0 : index
    %8 = vector.load %arg6[%c0_6, %c0_7] : memref<2x3xf32, #tpu.memory_space<vmem>>, vector<2x3xf32>
    tpu.vector_store %arg6[%c0_6, %c0_7], %7 {strides = array<i32>} : memref<2x3xf32, #tpu.memory_space<vmem>>, vector<2x3xf32>,
    %c0_i32_8 = arith.constant 0 : i32
    %9 = arith.cmpi eq, %arg2, %c0_i32_8 : i32
    %10 = arith.extui %9 : i1 to i32
    %c0_i32_9 = arith.constant 0 : i32
    %11 = arith.cmpi ne, %10, %c0_i32_9 : i32
    scf.if %11 {
      %c0_10 = arith.constant 0 : index
      %c0_11 = arith.constant 0 : index
      %12 = vector.load %arg6[%c0_10, %c0_11] : memref<2x3xf32, #tpu.memory_space<vmem>>, vector<2x3xf32>
      %c0_12 = arith.constant 0 : index
      %c0_13 = arith.constant 0 : index
      %13 = vector.load %arg5[%c0_12, %c0_13] : memref<2x3xf32, #tpu.memory_space<vmem>>, vector<2x3xf32>
      tpu.vector_store %arg5[%c0_12, %c0_13], %12 {strides = array<i32>} : memref<2x3xf32, #tpu.memory_space<vmem>>, vector<2x3xf32>,
    } else {
    }
    return
  }
  func.func @transform_0(%arg0: i32, %arg1: i32, %arg2: i32) -> (i32, i32) {
    %c0_i32 = arith.constant 0 : i32
    return %arg0, %arg2 : i32, i32
  }
  func.func @transform_1(%arg0: i32, %arg1: i32, %arg2: i32) -> (i32, i32) {
    %c0_i32 = arith.constant 0 : i32
    return %arg1, %arg2 : i32, i32
  }
  func.func @transform_2(%arg0: i32, %arg1: i32, %arg2: i32) -> (i32, i32) {
    %c0_i32 = arith.constant 0 : i32
    return %arg0, %arg1 : i32, i32
  }
}

</mosaic_0001>

<bundles_post_ra>
// kernel: tpu_custom_call.1
= control target key start
LH: loop header
LB: loop body
LE: loop exit
PB: predicated region body
PF: predicated region fallthrough
CT: control target
= control target key end

     0   :  { %7 = vsyncpa [#allocation4], 0  ;;  %s2879_s0 = inlined_call_operand.hbm [shape: f32[2,1097], index: 0, kind: input, shape index: {}]   ;;  %s2880_s1 = inlined_call_operand.hbm [shape: f32[3,1097], index: 1, kind: input, shape index: {}]   ;;  %s2881_s2 = inlined_call_operand.hbm [shape: f32[2,3], index: 2, kind: output, shape index: {}]  }
   0x1   :  { %8 = vsyncpa [#allocation7], 0 }
   0x2   :  { %9 = vsyncpa [#allocation5], 0  ;;  %s2606_s9 = smov [#allocation3]   ;;  %s2607_s11 = smov [#allocation6]  }
   0x3   :  { %s16_s10 = sshll.u32 %s2606_s9, 4  ;;  %s26_s12 = sshll.u32 %s2607_s11, 4  ;;  %s17_s10 = int_to_ptr.vmem [resolvable:$true] %s16_s10  ;;  %s27_s12 = int_to_ptr.vmem [resolvable:$true] %s26_s12 }
   0x4   :  { %s2534_s15 = scalar_lea.hbm %s2879_s0, 288 }
   0x5   :  { %p2535_p0 = scmp.ne.s32.totalorder %s2879_s0, %s2534_s15  ;;  %p2538_p1 = scmp.lt.u32.totalorder %s2534_s15, %s2879_s0 }
   0x7   :  { %p2540_p2 = pnand %p2538_p1, %p2535_p0 }
   0x9   :  { %2543 = shalt.err (!%p2540_p2)
}
   0xa   :  { %s2544_s20 = scalar_lea.vmem %s17_s10, 288  ;;  %p2549_p4 = scmp.lt.s32.totalorder %s17_s10, %s17_s10 }
   0xb   :  { %p2545_p3 = scmp.ne.s32.totalorder %s17_s10, %s2544_s20  ;;  %p2550_p5 = scmp.lt.s32.totalorder %s2544_s20, %s2544_s20 }
   0xd   :  { %p2551_p6 = por %p2550_p5, %p2549_p4 }
   0xf   :  { %p2552_p7 = pnand %p2551_p6, %p2545_p3 }
  0x11   :  { %2555 = shalt.err (!%p2552_p7)
}
  0x12   :  { %19 = dma.hbm_to_vmem [thread:$0]  %s2879_s0, 288, %s17_s10, [#allocation4]  }
  0x13   :  { %s2556_s25 = scalar_lea.hbm %s2880_s1, 576 }
  0x14   :  { %p2557_p8 = scmp.ne.s32.totalorder %s2880_s1, %s2556_s25  ;;  %p2560_p9 = scmp.lt.u32.totalorder %s2556_s25, %s2880_s1 }
  0x16   :  { %p2562_p10 = pnand %p2560_p9, %p2557_p8 }
  0x18   :  { %2565 = shalt.err (!%p2562_p10)
}
  0x19   :  { %s2566_s30 = scalar_lea.vmem %s27_s12, 576  ;;  %p2571_p12 = scmp.lt.s32.totalorder %s27_s12, %s27_s12 }
  0x1a   :  { %p2567_p11 = scmp.ne.s32.totalorder %s27_s12, %s2566_s30  ;;  %p2572_p13 = scmp.lt.s32.totalorder %s2566_s30, %s2566_s30 }
  0x1c   :  { %p2573_p0 = por %p2572_p13, %p2571_p12 }
  0x1e   :  { %p2574_p1 = pnand %p2573_p0, %p2567_p11 }
  0x20   :  { %2577 = shalt.err (!%p2574_p1)
}
  0x21   :  { %29 = dma.hbm_to_vmem [thread:$0]  %s2880_s1, 576, %s27_s12, [#allocation7]  }
  0x22   :  { %2600 = dma.done.wait [#allocation4], 288  }
  0x23   :  { %2601 = vsyncadd [#allocation4], 4294967008 }
  0x24   :  { %2602 = dma.done.wait [#allocation7], 576  }
  0x25   :  { %2603 = vsyncadd [#allocation7], 4294966720  ;;  %v58_v0 = vlaneseq  ;;  %v2608_v1 = vmov 1983009808   ;;  %v46_v6 = vld [vmem:[#allocation6] sm:$0x77] }
  0x26   :  { %v56_v2 = vunpack.c.l.s4 %v2608_v1  ;;  %v43_v7 = vld [vmem:[#allocation3] sm:$0xff]  ;;  %v108_v9 = vcombine.high %v46_v6, %v46_v6  ;;  %v2653_v10 = vand.u32 4294901760, %v46_v6  ;;  %v44_v40 = vld [vmem:[#allocation3 + $0x8] sm:$0xff]  ;;  %vm116_vm0 = vcmask 596992   ;;  %s2611_s1 = smov [#allocation8]  }
  0x27   :  { %v59_v3 = vshrl.u32 %v58_v0, 7  ;;  %v47_v8 = vld [vmem:[#allocation6 + $0x8] sm:$0x77]  ;;  %v54_v11 = vcombine.high %v43_v7, %v43_v7  ;;  %v48_v37 = vld [vmem:[#allocation6 + $0x10] sm:$0x77]  ;;  %v71_v59 = vcombine.high %v44_v40, %v44_v40  ;;  %vm2610_vm1 = vmmov 0  }
  0x28   :  { %v57_v4 = vunpack.c.0.s8 %v56_v2  ;;  %v109_v13 = vcombine.high %v47_v8, %v47_v8  ;;  %v121_v14 = vand.u32 4294901760, %v108_v9  ;;  %v2657_v15 = vsub.f32 %v46_v6, %v2653_v10  ;;  %v49_v1 = vld [vmem:[#allocation6 + $0x18] sm:$0x77]  ;;  %s2469_s4 = sshll.u32 %s2611_s1, 4  ;;  %s2470_s4 = int_to_ptr.vmem [resolvable:$true] %s2469_s4 }
  0x29   :  { %v2663_v19 = vand.u32 4294901760, %v47_v8  ;;  %v110_v46 = vcombine.high %v48_v37, %v48_v37  ;;  %v2709_v57 = vand.u32 4294901760, %v48_v37  ;;  %vm40_vm2 = vcmask 17408   ;;  %s2578_s5 = scalar_lea.vmem %s2470_s4, 32  ;;  %p2583_p3 = scmp.lt.s32.totalorder %s2470_s4, %s2470_s4 }
  0x2a   :  { %v2651_v5 = vsub.s32 %v57_v4, %v59_v3  ;;  %v2661_v18 = vand.u32 4294901760, %v109_v13  ;;  %122 = vmatprep.subr.mxu0 %v121_v14  ;;  %v204_v21 = vsub.f32 %v108_v9, %v121_v14  ;;  %v211_v22 = vand.u32 4294901760, %v2657_v15  ;;  %p2579_p2 = scmp.ne.s32.totalorder %s2470_s4, %s2578_s5  ;;  %p2584_p4 = scmp.lt.s32.totalorder %s2578_s5, %s2578_s5 }
  0x2b   :  { %124 = vmatpush1.xpose.msra.mxu0 %v2653_v10  ;;  %v2682_v36 = vsub.f32 %v47_v8, %v2663_v19  ;;  %v2698_v54 = vand.u32 4294901760, %v110_v46  ;;  %v2724_v3 = vsub.f32 %v48_v37, %v2709_v57 }
  0x2c   :  { %v61_v12 = vrot.slane %v43_v7, %v2651_v5  ;;  %v68_v20 = vrot.slane %v54_v11, %v2651_v5  ;;  %v205_v26 = vand.u32 4294901760, %v204_v21  ;;  %v212_v27 = vsub.f32 %v2657_v15, %v211_v22  ;;  %287 = vmatprep.subr.mxu0 %v204_v21  ;;  %p2585_p5 = por %p2584_p4, %p2583_p3 }
  0x2d   :  { %v2675_v30 = vsub.f32 %v109_v13, %v2661_v18  ;;  %v683_v48 = vand.u32 4294901760, %v2682_v36  ;;  %v78_v49 = vrot.slane %v44_v40, %v2651_v5  ;;  %v2717_v62 = vsub.f32 %v110_v46, %v2698_v54 }
  0x2e   :  { %v69_v16 = vcombine.high %v61_v12, %v61_v12  ;;  %v2659_v17 = vand.u32 4294901760, %v61_v12  ;;  %v70_v25 = vcombine.high %v68_v20, %v68_v20  ;;  %v2679_v32 = vand.u32 4294901760, %v68_v20  ;;  %p2586_p6 = pnand %p2585_p5, %p2579_p2 }
  0x2f   :  { %v206_v33 = vsub.f32 %v204_v21, %v205_v26  ;;  %v213_v38 = vand.u32 4294901760, %v212_v27  ;;  %v677_v44 = vand.u32 4294901760, %v2675_v30  ;;  %v86_v51 = vcombine.high %v78_v49, %v78_v49 }
  0x30   :  { %v2667_v23 = vand.u32 4294901760, %v69_v16  ;;  %v194_v24 = vsub.f32 %v61_v12, %v2659_v17  ;;  %v2677_v31 = vand.u32 4294901760, %v70_v25  ;;  %v2689_v45 = vsub.f32 %v68_v20, %v2679_v32 }
  0x31   :  { %v207_v41 = vand.u32 4294901760, %v206_v33  ;;  %v678_v52 = vsub.f32 %v2675_v30, %v677_v44  ;;  %v684_v55 = vsub.f32 %v2682_v36, %v683_v48  ;;  %v2711_v58 = vand.u32 4294901760, %v86_v51  ;;  %v50_v33 = vld [vmem:[#allocation6 + $0x20] sm:$0x7] }
  0x32   :  { %v188_v28 = vsub.f32 %v69_v16, %v2667_v23  ;;  %v195_v29 = vand.u32 4294901760, %v194_v24  ;;  %278 = vmatprep.mubr.f32.mxu1 %v2667_v23  ;;  %v2685_v39 = vsub.f32 %v70_v25, %v2677_v31  ;;  %v667_v53 = vand.u32 4294901760, %v2689_v45 }
  0x33   :  { %208 = vmatprep.subr.mxu1 %v207_v41  ;;  %v679_v60 = vand.u32 4294901760, %v678_v52  ;;  %v2719_v63 = vand.u32 4294901760, %v78_v49  ;;  %v685_v0 = vand.u32 4294901760, %v684_v55  ;;  %v2727_v4 = vsub.f32 %v86_v51, %v2711_v58 }
  0x34   :  { %v189_v34 = vand.u32 4294901760, %v188_v28  ;;  %v196_v35 = vsub.f32 %v194_v24, %v195_v29  ;;  %214 = vmatpush1.xpose.msra.mxu1 %v213_v38  ;;  %v661_v50 = vand.u32 4294901760, %v2685_v39  ;;  %v668_v61 = vsub.f32 %v2689_v45, %v667_v53 }
  0x35   :  { %364 = vmatprep.subr.mxu1 %v121_v14  ;;  %v85_v6 = vrot.slane %v71_v59, %v2651_v5  ;;  %v1149_v8 = vand.u32 4294901760, %v2717_v62  ;;  %v2735_v9 = vsub.f32 %v78_v49, %v2719_v63  ;;  %v1155_v5 = vand.u32 4294901760, %v2724_v3 }
  0x36   :  { %v190_v42 = vsub.f32 %v188_v28, %v189_v34  ;;  %v197_v43 = vand.u32 4294901760, %v196_v35  ;;  %v662_v56 = vsub.f32 %v2685_v39, %v661_v50  ;;  %v669_v7 = vand.u32 4294901760, %v668_v61  ;;  %v2479_v35 = vld.sshfl [vmem:[#allocation3 + $0x10] sm:$0x3 pattern:$0x76325410] }
  0x37   :  { %280 = vmatmul.mubr.f32.vlgmr.msra.gmra.mrb[0].mxu1 %v2659_v17  ;;  %v1133_v11 = vand.u32 4294901760, %v2727_v4  ;;  %v87_v12 = vcombine.high %v85_v6, %v85_v6  ;;  %v1150_v13 = vsub.f32 %v2717_v62, %v1149_v8  ;;  %v1156_v16 = vsub.f32 %v2724_v3, %v1155_v5 }
  0x38   :  { %v191_v47 = vand.u32 4294901760, %v190_v42  ;;  %366 = vmatpush1.xpose.msra.mxu1 %v2653_v10  ;;  %432 = vmatprep.mubr.f32.mxu1 %v189_v34  ;;  %v663_v2 = vand.u32 4294901760, %v662_v56  ;;  %v2760_v20 = vand.u32 4294901760, %v49_v1  ;;  %v2776_v25 = vand.u32 4294901760, %v85_v6 }
  0x39   :  { %520 = vmatprep.subr.mxu1 %v121_v14  ;;  %v1139_v14 = vand.u32 4294901760, %v2735_v9  ;;  %v2762_v21 = vand.u32 4294901760, %v87_v12  ;;  %v117_v38 = vsel %vm116_vm0, %v2479_v35, 0  ;;  %v2609_v55 = vmov 0.0  }
  0x3a   :  { %192 = vmatprep.mubr.f32.mxu0 %v191_v47  ;;  %v2785_v27 = vsub.f32 %v49_v1, %v2760_v20  ;;  %41 = vst.msk [vmem:[#allocation2] sm:$0x3] %vm40_vm2, %v2609_v55 }
  0x3b   :  { %198 = vmatmul.mubr.f32.vlgmr.msra.gmra.mrb[0].mxu0 %v197_v43  ;;  %436 = vmatmul.mubr.f32.vlgmr.msra.gmra.mrb[2].mxu1 %v195_v29 }
  0x3c   :  { %290 = vmatpush1.xpose.msra.mxu0 %v2657_v15  ;;  %355 = vmatprep.mubr.f32.mxu0 %v188_v28  ;;  %v2788_v28 = vsub.f32 %v87_v12, %v2762_v21  ;;  %v1627_v34 = vand.u32 4294901760, %v2785_v27 }
  0x3d   :  { %444 = vmatprep.subr.mxu0 %v205_v26  ;;  %522 = vmatpush1.xpose.msra.mxu1 %v2653_v10  ;;  %v111_v10 = vcombine.high %v49_v1, %v49_v1 }
  0x3e   :  { %586 = vmatprep.mubr.f32.mxu1 %v2667_v23  ;;  %680 = vmatprep.subr.mxu1 %v679_v60 }
  0x3f   :  { %358 = vmatmul.mubr.f32.vlgmr.msra.gmra.mrb[2].mxu0 %v194_v24  ;;  %v2748_v15 = vand.u32 4294901760, %v111_v10 }
  0x40   :  { %448 = vmatpush1.xpose.msra.mxu0 %v211_v22  ;;  %512 = vmatprep.mubr.f32.mxu0 %v2667_v23  ;;  %v1151_v22 = vand.u32 4294901760, %v1150_v13  ;;  %v1140_v23 = vsub.f32 %v2735_v9, %v1139_v14 }
  0x41   :  { %594 = vmatprep.subr.mxu0 %v2661_v18  ;;  %588 = vmatmul.mubr.f32.vlgmr.msra.gmra.mrb[4].mxu1 %v2659_v17  ;;  %v2774_v24 = vsub.f32 %v111_v10, %v2748_v15 }
  0x42   :  { %686 = vmatpush1.xpose.msra.mxu1 %v685_v0  ;;  %750 = vmatprep.mubr.f32.mxu1 %v2677_v31  ;;  %v1141_v29 = vand.u32 4294901760, %v1140_v23 }
  0x43   :  { %514 = vmatmul.mubr.f32.vlgmr.msra.gmra.mrb[4].mxu0 %v2659_v17  ;;  %836 = vmatprep.subr.mxu1 %v2661_v18  ;;  %v1134_v17 = vsub.f32 %v2727_v4, %v1133_v11 }
  0x44   :  { %596 = vmatpush1.xpose.msra.mxu0 %v2663_v19  ;;  %664 = vmatprep.mubr.f32.mxu0 %v663_v2 }
  0x45   :  { %759 = vmatprep.subr.mxu0 %v2675_v30  ;;  %752 = vmatmul.mubr.f32.vlgmr.msra.gmra.mrb[6].mxu1 %v2679_v32  ;;  %v1135_v26 = vand.u32 4294901760, %v1134_v17  ;;  %v2795_v30 = vsub.f32 %v85_v6, %v2776_v25 }
  0x46   :  { %838 = vmatpush1.xpose.msra.mxu1 %v2663_v19  ;;  %904 = vmatprep.mubr.f32.mxu1 %v661_v50 }
  0x47   :  { %670 = vmatmul.mubr.f32.vlgmr.msra.gmra.mrb[6].mxu0 %v669_v7  ;;  %992 = vmatprep.subr.mxu1 %v2661_v18  ;;  %v1157_v18 = vand.u32 4294901760, %v1156_v16 }
  0x48   :  { %762 = vmatpush1.xpose.msra.mxu0 %v2682_v36  ;;  %827 = vmatprep.mubr.f32.mxu0 %v2685_v39  ;;  %v119_v36 = vsel %vm116_vm0, %v50_v33, 0  ;;  %v1628_v39 = vsub.f32 %v2785_v27, %v1627_v34 }
  0x49   :  { %916 = vmatprep.subr.mxu0 %v677_v44  ;;  %908 = vmatmul.mubr.f32.vlgmr.msra.gmra.mrb[8].mxu1 %v667_v53  ;;  %v2814_v41 = vand.u32 4294901760, %v119_v36  ;;  %v2823_v44 = vand.u32 4294901760, %v117_v38 }
  0x4a   :  { %994 = vmatpush1.xpose.msra.mxu1 %v2663_v19  ;;  %1058 = vmatprep.mubr.f32.mxu1 %v2677_v31  ;;  %v1621_v19 = vand.u32 4294901760, %v2774_v24 }
  0x4b   :  { %830 = vmatmul.mubr.f32.vlgmr.msra.gmra.mrb[8].mxu0 %v2689_v45  ;;  %1152 = vmatprep.subr.mxu1 %v1151_v22  ;;  %v1629_v45 = vand.u32 4294901760, %v1628_v39  ;;  %v2087_v47 = vsub.f32 %v119_v36, %v2814_v41  ;;  %v2076_v49 = vsub.f32 %v117_v38, %v2823_v44 }
  0x4c   :  { %920 = vmatpush1.xpose.msra.mxu0 %v683_v48  ;;  %984 = vmatprep.mubr.f32.mxu0 %v2677_v31  ;;  %v1605_v31 = vand.u32 4294901760, %v2788_v28  ;;  %v1622_v37 = vsub.f32 %v2774_v24, %v1621_v19 }
  0x4d   :  { %1066 = vmatprep.subr.mxu0 %v2698_v54  ;;  %1060 = vmatmul.mubr.f32.vlgmr.msra.gmra.mrb[10].mxu1 %v2679_v32  ;;  %v2088_v50 = vand.u32 4294901760, %v2087_v47  ;;  %v2077_v51 = vand.u32 4294901760, %v2076_v49 }
  0x4e   :  { %1158 = vmatpush1.xpose.msra.mxu1 %v1157_v18  ;;  %1222 = vmatprep.mubr.f32.mxu1 %v2711_v58  ;;  %v1606_v40 = vsub.f32 %v2788_v28, %v1605_v31  ;;  %v1623_v42 = vand.u32 4294901760, %v1622_v37 }
  0x4f   :  { %986 = vmatmul.mubr.f32.vlgmr.msra.gmra.mrb[10].mxu0 %v2679_v32  ;;  %1308 = vmatprep.subr.mxu1 %v2698_v54  ;;  %v1611_v32 = vand.u32 4294901760, %v2795_v30  ;;  %v2089_v52 = vsub.f32 %v2087_v47, %v2088_v50  ;;  %v2078_v53 = vsub.f32 %v2076_v49, %v2077_v51 }
  0x50   :  { %1068 = vmatpush1.xpose.msra.mxu0 %v2709_v57  ;;  %1136 = vmatprep.mubr.f32.mxu0 %v1135_v26  ;;  %v1607_v46 = vand.u32 4294901760, %v1606_v40 }
  0x51   :  { %1231 = vmatprep.subr.mxu0 %v2717_v62  ;;  %1224 = vmatmul.mubr.f32.vlgmr.msra.gmra.mrb[12].mxu1 %v2719_v63  ;;  %v1612_v43 = vsub.f32 %v2795_v30, %v1611_v32  ;;  %v2079_v56 = vand.u32 4294901760, %v2078_v53 }
  0x52   :  { %1310 = vmatpush1.xpose.msra.mxu1 %v2709_v57  ;;  %1376 = vmatprep.mubr.f32.mxu1 %v1133_v11 }
  0x53   :  { %1142 = vmatmul.mubr.f32.vlgmr.msra.gmra.mrb[12].mxu0 %v1141_v29  ;;  %1464 = vmatprep.subr.mxu1 %v2698_v54  ;;  %v1613_v48 = vand.u32 4294901760, %v1612_v43  ;;  %v2090_v54 = vand.u32 4294901760, %v2089_v52 }
  0x54   :  { %1234 = vmatpush1.xpose.msra.mxu0 %v2724_v3  ;;  %1299 = vmatprep.mubr.f32.mxu0 %v2727_v4 }
  0x55   :  { %1388 = vmatprep.subr.mxu0 %v1149_v8  ;;  %1380 = vmatmul.mubr.f32.vlgmr.msra.gmra.mrb[14].mxu1 %v1139_v14 }
  0x56   :  { %1466 = vmatpush1.xpose.msra.mxu1 %v2709_v57  ;;  %1530 = vmatprep.mubr.f32.mxu1 %v2711_v58 }
  0x57   :  { %1302 = vmatmul.mubr.f32.vlgmr.msra.gmra.mrb[14].mxu0 %v2735_v9  ;;  %1624 = vmatprep.subr.mxu1 %v1623_v42 }
  0x58   :  { %1392 = vmatpush1.xpose.msra.mxu0 %v1155_v5  ;;  %1456 = vmatprep.mubr.f32.mxu0 %v2711_v58 }
  0x59   :  { %1538 = vmatprep.subr.mxu0 %v2748_v15  ;;  %1532 = vmatmul.mubr.f32.vlgmr.msra.gmra.mrb[16].mxu1 %v2719_v63 }
  0x5a   :  { %1630 = vmatpush1.xpose.msra.mxu1 %v1629_v45  ;;  %1694 = vmatprep.mubr.f32.mxu1 %v2762_v21 }
  0x5b   :  { %1458 = vmatmul.mubr.f32.vlgmr.msra.gmra.mrb[16].mxu0 %v2719_v63  ;;  %1780 = vmatprep.subr.mxu1 %v2748_v15 }
  0x5c   :  { %1540 = vmatpush1.xpose.msra.mxu0 %v2760_v20  ;;  %1608 = vmatprep.mubr.f32.mxu0 %v1607_v46 }
  0x5d   :  { %1703 = vmatprep.subr.mxu0 %v2774_v24  ;;  %1696 = vmatmul.mubr.f32.vlgmr.msra.gmra.mrb[18].mxu1 %v2776_v25 }
  0x5e   :  { %1782 = vmatpush1.xpose.msra.mxu1 %v2760_v20  ;;  %1848 = vmatprep.mubr.f32.mxu1 %v1605_v31 }
  0x5f   :  { %1614 = vmatmul.mubr.f32.vlgmr.msra.gmra.mrb[18].mxu0 %v1613_v48  ;;  %1936 = vmatprep.subr.mxu1 %v2748_v15 }
  0x60   :  { %1706 = vmatpush1.xpose.msra.mxu0 %v2785_v27  ;;  %1771 = vmatprep.mubr.f32.mxu0 %v2788_v28 }
  0x61   :  { %1860 = vmatprep.subr.mxu0 %v1621_v19  ;;  %1852 = vmatmul.mubr.f32.vlgmr.msra.gmra.mrb[20].mxu1 %v1611_v32 }
  0x62   :  { %1938 = vmatpush1.xpose.msra.mxu1 %v2760_v20  ;;  %2002 = vmatprep.mubr.f32.mxu1 %v2762_v21 }
  0x63   :  { %1774 = vmatmul.mubr.f32.vlgmr.msra.gmra.mrb[20].mxu0 %v2795_v30  ;;  %2497 = vmatprep.subr.mxu1 %v2609_v55 }
  0x64   :  { %1864 = vmatpush1.xpose.msra.mxu0 %v1627_v34  ;;  %1928 = vmatprep.mubr.f32.mxu0 %v2762_v21 }
  0x65   :  { %2492 = vmatprep.subr.mxu0 %v2609_v55  ;;  %2004 = vmatmul.mubr.f32.vlgmr.msra.gmra.mrb[22].mxu1 %v2776_v25 }
  0x66   :  { %2498 = vmatpush3.xpose.msra.mxu1 %v2090_v54  ;;  %2499 = vmatprep.mubr.msk.f32.mxu1 %vm2610_vm1, %v2609_v55 }
  0x67   :  { %1930 = vmatmul.mubr.f32.vlgmr.msra.gmra.mrb[22].mxu0 %v2776_v25  ;;  %2507 = vmatprep.subr.mxu1 %v2609_v55 }
  0x68   :  { %2493 = vmatpush3.xpose.msra.mxu0 %v2814_v41  ;;  %2494 = vmatprep.mubr.msk.f32.mxu0 %vm2610_vm1, %v2609_v55 }
  0x69   :  { %2502 = vmatprep.subr.mxu0 %v2609_v55  ;;  %2500 = vmatmul.mubr.f32.vlgmr.msra.gmra.mrb[24].mxu1 %v2823_v44 }
  0x6a   :  { %2508 = vmatpush3.xpose.msra.mxu1 %v2814_v41  ;;  %2509 = vmatprep.mubr.msk.f32.mxu1 %vm2610_vm1, %v2609_v55 }
  0x6b   :  { %2495 = vmatmul.mubr.f32.vlgmr.msra.gmra.mrb[24].mxu0 %v2079_v56  ;;  %2517 = vmatprep.subr.mxu1 %v2609_v55 }
  0x6c   :  { %2503 = vmatpush3.xpose.msra.mxu0 %v2087_v47  ;;  %2504 = vmatprep.mubr.msk.f32.mxu0 %vm2610_vm1, %v2609_v55 }
  0x6d   :  { %2512 = vmatprep.subr.mxu0 %v2609_v55  ;;  %2510 = vmatmul.mubr.f32.vlgmr.msra.gmra.mrb[26].mxu1 %v2077_v51 }
  0x6e   :  { %2518 = vmatpush3.xpose.msra.mxu1 %v2814_v41  ;;  %2519 = vmatprep.mubr.msk.f32.mxu1 %vm2610_vm1, %v2609_v55 }
  0x6f   :  { %2505 = vmatmul.mubr.f32.vlgmr.msra.gmra.mrb[26].mxu0 %v2076_v49 }
  0x70   :  { %2513 = vmatpush3.xpose.msra.mxu0 %v2088_v50  ;;  %2514 = vmatprep.mubr.msk.f32.mxu0 %vm2610_vm1, %v2609_v55 }
  0x71   :  { %2520 = vmatmul.mubr.f32.vlgmr.msra.gmra.mrb[28].mxu1 %v2823_v44 }
  0x73   :  { %2515 = vmatmul.mubr.f32.vlgmr.msra.gmra.mrb[28].mxu0 %v2823_v44 }
 0x10a   :  { %v281_v59 = vpop.f32.mrb[0].mxu1 }
 0x10b   :  { %v283_v61 = vpop.f32.mrb[1].mxu1 }
 0x10e   :  { %v199_v57 = vpop.f32.mrb[0].mxu0  ;;  %v437_v1 = vpop.f32.mrb[2].mxu1 }
 0x10f   :  { %v201_v58 = vpop.f32.mrb[1].mxu0  ;;  %v282_v60 = vadd.f32 %v281_v59, %v199_v57  ;;  %v439_v2 = vpop.f32.mrb[3].mxu1 }
 0x112   :  { %v359_v62 = vpop.f32.mrb[2].mxu0 }
 0x113   :  { %v360_v63 = vadd.f32 %v359_v62, %v282_v60  ;;  %v361_v0 = vpop.f32.mrb[3].mxu0 }
 0x114   :  { %v589_v8 = vpop.f32.mrb[4].mxu1 }
 0x115   :  { %v438_v3 = vadd.f32 %v437_v1, %v360_v63  ;;  %v591_v9 = vpop.f32.mrb[5].mxu1 }
 0x116   :  { %v515_v4 = vpop.f32.mrb[4].mxu0 }
 0x117   :  { %v516_v6 = vadd.f32 %v515_v4, %v438_v3  ;;  %v517_v7 = vpop.f32.mrb[5].mxu0 }
 0x118   :  { %v753_v13 = vpop.f32.mrb[6].mxu1 }
 0x119   :  { %v590_v10 = vadd.f32 %v589_v8, %v516_v6  ;;  %v755_v14 = vpop.f32.mrb[7].mxu1 }
 0x11a   :  { %v671_v5 = vpop.f32.mrb[6].mxu0 }
 0x11b   :  { %v672_v11 = vadd.f32 %v671_v5, %v590_v10  ;;  %v673_v12 = vpop.f32.mrb[7].mxu0 }
 0x11c   :  { %v909_v21 = vpop.f32.mrb[8].mxu1 }
 0x11d   :  { %v754_v15 = vadd.f32 %v753_v13, %v672_v11  ;;  %v911_v22 = vpop.f32.mrb[9].mxu1 }
 0x11e   :  { %v831_v16 = vpop.f32.mrb[8].mxu0 }
 0x11f   :  { %v832_v17 = vadd.f32 %v831_v16, %v754_v15  ;;  %v833_v20 = vpop.f32.mrb[9].mxu0  ;;  %v42_v16 = vld [vmem:[#allocation2] sm:$0x3] }
 0x120   :  { %v1061_v26 = vpop.f32.mrb[10].mxu1 }
 0x121   :  { %v910_v23 = vadd.f32 %v909_v21, %v832_v17  ;;  %v1063_v27 = vpop.f32.mrb[11].mxu1 }
 0x122   :  { %v987_v24 = vpop.f32.mrb[10].mxu0 }
 0x123   :  { %v988_v25 = vadd.f32 %v987_v24, %v910_v23  ;;  %v989_v18 = vpop.f32.mrb[11].mxu0 }
 0x124   :  { %v1225_v33 = vpop.f32.mrb[12].mxu1 }
 0x125   :  { %v1062_v28 = vadd.f32 %v1061_v26, %v988_v25  ;;  %v1227_v34 = vpop.f32.mrb[13].mxu1 }
 0x126   :  { %v1143_v29 = vpop.f32.mrb[12].mxu0 }
 0x127   :  { %v1144_v19 = vadd.f32 %v1143_v29, %v1062_v28  ;;  %v1145_v30 = vpop.f32.mrb[13].mxu0 }
 0x128   :  { %v1381_v32 = vpop.f32.mrb[14].mxu1 }
 0x129   :  { %v1226_v31 = vadd.f32 %v1225_v33, %v1144_v19  ;;  %v1383_v38 = vpop.f32.mrb[15].mxu1 }
 0x12a   :  { %v1303_v35 = vpop.f32.mrb[14].mxu0 }
 0x12b   :  { %v1304_v36 = vadd.f32 %v1303_v35, %v1226_v31  ;;  %v1305_v37 = vpop.f32.mrb[15].mxu0 }
 0x12c   :  { %v1533_v43 = vpop.f32.mrb[16].mxu1 }
 0x12d   :  { %v1382_v39 = vadd.f32 %v1381_v32, %v1304_v36  ;;  %v1535_v44 = vpop.f32.mrb[17].mxu1 }
 0x12e   :  { %v1459_v40 = vpop.f32.mrb[16].mxu0 }
 0x12f   :  { %v1460_v41 = vadd.f32 %v1459_v40, %v1382_v39  ;;  %v1461_v42 = vpop.f32.mrb[17].mxu0 }
 0x130   :  { %v1697_v49 = vpop.f32.mrb[18].mxu1 }
 0x131   :  { %v1534_v45 = vadd.f32 %v1533_v43, %v1460_v41  ;;  %v1699_v50 = vpop.f32.mrb[19].mxu1 }
 0x132   :  { %v1615_v46 = vpop.f32.mrb[18].mxu0 }
 0x133   :  { %v1616_v47 = vadd.f32 %v1615_v46, %v1534_v45  ;;  %v1617_v48 = vpop.f32.mrb[19].mxu0 }
 0x134   :  { %v1853_v55 = vpop.f32.mrb[20].mxu1 }
 0x135   :  { %v1698_v51 = vadd.f32 %v1697_v49, %v1616_v47  ;;  %v1855_v56 = vpop.f32.mrb[21].mxu1 }
 0x136   :  { %v1775_v52 = vpop.f32.mrb[20].mxu0 }
 0x137   :  { %v1776_v53 = vadd.f32 %v1775_v52, %v1698_v51  ;;  %v1777_v54 = vpop.f32.mrb[21].mxu0 }
 0x138   :  { %v2005_v61 = vpop.f32.mrb[22].mxu1 }
 0x139   :  { %v1854_v57 = vadd.f32 %v1853_v55, %v1776_v53  ;;  %v2007_v62 = vpop.f32.mrb[23].mxu1 }
 0x13a   :  { %v1931_v58 = vpop.f32.mrb[22].mxu0 }
 0x13b   :  { %v1932_v59 = vadd.f32 %v1931_v58, %v1854_v57  ;;  %v1933_v60 = vpop.f32.mrb[23].mxu0 }
 0x13c   :  { %v2157_v3 = vpop.f32.mrb[24].mxu1 }
 0x13d   :  { %v2006_v63 = vadd.f32 %v2005_v61, %v1932_v59  ;;  %v2501_v4 = vpop.f32.mrb[25].mxu1 }
 0x13e   :  { %v2081_v0 = vpop.f32.mrb[24].mxu0 }
 0x13f   :  { %v2082_v1 = vadd.f32 %v2081_v0, %v2006_v63  ;;  %v2496_v2 = vpop.f32.mrb[25].mxu0 }
 0x140   :  { %v2305_v10 = vpop.f32.mrb[26].mxu1 }
 0x141   :  { %v2158_v6 = vadd.f32 %v2157_v3, %v2082_v1  ;;  %v2511_v5 = vpop.f32.mrb[27].mxu1 }
 0x142   :  { %v2231_v7 = vpop.f32.mrb[26].mxu0 }
 0x143   :  { %v2232_v8 = vadd.f32 %v2231_v7, %v2158_v6  ;;  %v2506_v9 = vpop.f32.mrb[27].mxu0 }
 0x144   :  { %v2451_v15 = vpop.f32.mrb[28].mxu1 }
 0x145   :  { %v2306_v11 = vadd.f32 %v2305_v10, %v2232_v8  ;;  %v2521_v17 = vpop.f32.mrb[29].mxu1 }
 0x146   :  { %v2379_v12 = vpop.f32.mrb[28].mxu0 }
 0x147   :  { %v2380_v13 = vadd.f32 %v2379_v12, %v2306_v11  ;;  %v2516_v14 = vpop.f32.mrb[29].mxu0 }
 0x149   :  { %v2452_v20 = vadd.f32 %v2451_v15, %v2380_v13 }
 0x14b   :  { %v2455_v21 = vadd.f32 %v2452_v20, %v42_v16 }
 0x14d   :  { %2457 = vst.msk [vmem:[#allocation2] sm:$0x3] %vm40_vm2, %v2455_v21 }
 0x154   :  { %v2461_v22 = vld [vmem:[#allocation2] sm:$0x3] }
 0x155   :  { %2462 = vst.msk [vmem:[#allocation8] sm:$0x3] %vm40_vm2, %v2461_v22 }
 0x156   :  { %2589 = shalt.err (!%p2586_p6)
}
 0x157   :  { %s2590_s8 = scalar_lea.hbm %s2881_s2, 32 }
 0x158   :  { %p2591_p7 = scmp.ne.s32.totalorder %s2881_s2, %s2590_s8  ;;  %p2594_p8 = scmp.lt.u32.totalorder %s2590_s8, %s2881_s2 }
 0x15a   :  { %p2596_p9 = pnand %p2594_p8, %p2591_p7 }
 0x15c   :  { %2599 = shalt.err (!%p2596_p9)
}
 0x15d   :  { %2472 = dma.vmem_to_hbm [thread:$0]  %s2470_s4, 32, %s2881_s2, [#allocation5]  }
 0x15e   :  { %2604 = dma.done.wait [#allocation5], 32  }
 0x15f   :  { %2605 = vsyncadd [#allocation5], 4294967264 }
 0x160   :  { %2476 = vsyncpa [#allocation4], 1 }
 0x161   :  { %2477 = vsyncpa [#allocation7], 1 }
 0x162   :  { %2478 = vsyncpa [#allocation5], 1 }

</bundles_post_ra>
